<compile_context>
chip_gen: v5e
topology: v5e:2x2
jax: 0.10.0
libtpu: 0.0.40
codegen_flags: <defaults>
</compile_context>

<pallas_src>
import math

import jax
import jax.numpy as jnp
from jax.experimental import pallas as pl
from jax.experimental.pallas import tpu as pltpu


def _norm_kernel(x_ref, scale_ref, bias_ref, o_ref):
    s = scale_ref[...].astype(jnp.float32)      # (1, td)
    b = bias_ref[...].astype(jnp.float32)       # (1, td)
    x = x_ref[...].astype(jnp.float32)          # (tb, td)
    o_ref[...] = ((s * s) * x - b).astype(o_ref.dtype)


def _tpu_generation():
    """Per-generation (tile_bytes, vmem_limit_bytes, multi_tensorcore)."""
    try:
        kind = jax.devices()[0].device_kind.lower()
    except Exception:
        kind = ""
    if "v7" in kind:
        # 64 MiB physical VMEM, ~3.2 TB/s HBM, 2 TensorCores per chip.
        return 8 * 1024 * 1024, 48 * 1024 * 1024, True
    if "v4" in kind:
        return 8 * 1024 * 1024, 64 * 1024 * 1024, True
    if "v5" in kind or "v6" in kind:
        # v5e / v6e: 128 MiB physical VMEM, 1 TensorCore (v5p: 2-TC megacore).
        return 8 * 1024 * 1024, 64 * 1024 * 1024, ("v5p" in kind)
    # Unknown chip: conservative defaults.
    return 4 * 1024 * 1024, 32 * 1024 * 1024, False


def norm_layer(x, scale, bias):
    """_NormLayer forward: square(scale) * x - bias.

    x: (B, D); scale, bias: (1, D).
    """
    B, D = x.shape
    assert scale.shape == (1, D) and bias.shape == (1, D)

    target_block_bytes, vmem_limit_bytes, multi_tc = _tpu_generation()

    out_dtype = x.dtype
    itemsize = jnp.dtype(x.dtype).itemsize
    # Minimum sublane rows for an aligned tile: f32 -> 8, bf16 -> 16, int8 -> 32.
    min_rows = max(8, 32 // itemsize)

    # ---- Lane layout (never pays an HBM copy) -------------------------------
    #   D % 128 == 0            : already lane-dense.
    #   D < 128 and fold_k | B  : fold fold_k rows into lanes (free reshape).
    #   otherwise               : block last dim = full D (legal); the trailing
    #                             partial vreg gets masked stores, far cheaper
    #                             than an extra pad/slice pass over HBM.
    fold_k = 1
    if D % 128 != 0 and D < 128:
        k = 128 // math.gcd(D, 128)
        if B % k == 0:
            fold_k = k

    if fold_k > 1:
        Bf, Df = B // fold_k, fold_k * D
        x2 = x.reshape(Bf, Df)            # contiguous reshape: metadata only
        scale2 = jnp.tile(scale, (1, fold_k))   # KB-scale, negligible
        bias2 = jnp.tile(bias, (1, fold_k))
    else:
        Bf, Df = B, D
        x2, scale2, bias2 = x, scale, bias

    # ---- Lane tile td --------------------------------------------------------
    if Df % 128 == 0:
        lane_cap = max(128, (target_block_bytes // (min_rows * itemsize)) // 128 * 128)
        if Df <= lane_cap:
            td = Df
        else:
            m = Df // 128
            t = 1
            for cand in range(lane_cap // 128, 0, -1):
                if m % cand == 0:
                    t = cand
                    break
            td = 128 * t
    else:
        td = Df                            # full-extent lane block (masked tail)
    nd = Df // td                          # td always divides Df here

    # ---- Batch tile: ~target_block_bytes of x per step; no wrapper padding. --
    # pl.cdiv grid + Pallas' ragged final block handle any B.
    rows_target = max(min_rows, target_block_bytes // (td * itemsize))
    if rows_target >= Bf:
        if multi_tc and Bf >= 2 * min_rows:
            # Split in two so both TensorCores get a parallel grid step.
            half = (Bf + 1) // 2
            block_b = ((half + min_rows - 1) // min_rows) * min_rows
        else:
            block_b = Bf                   # full extent: always a legal block
    else:
        block_b = max(min_rows, (rows_target // min_rows) * min_rows)
    nb = pl.cdiv(Bf, block_b)

    cost = pl.CostEstimate(
        flops=2 * B * D,
        transcendentals=0,
        bytes_accessed=2 * B * D * itemsize + 2 * D * itemsize,
    )

    out = pl.pallas_call(
        _norm_kernel,
        out_shape=jax.ShapeDtypeStruct((Bf, Df), out_dtype),
        grid_spec=pltpu.PrefetchScalarGridSpec(
            num_scalar_prefetch=0,
            # Lane axis outer, batch inner: scale/bias block index is constant
            # across the inner loop so their DMA is not re-issued per step.
            grid=(nd, nb),
            in_specs=[
                pl.BlockSpec((block_b, td), lambda j, i: (i, j)),  # x tile
                pl.BlockSpec((1, td), lambda j, i: (0, j)),        # scale
                pl.BlockSpec((1, td), lambda j, i: (0, j)),        # bias
            ],
            out_specs=pl.BlockSpec((block_b, td), lambda j, i: (i, j)),
        ),
        compiler_params=pltpu.CompilerParams(
            dimension_semantics=("parallel", "parallel"),
            vmem_limit_bytes=vmem_limit_bytes,
        ),
        cost_estimate=cost,
    )(x2, scale2, bias2)

    if fold_k > 1:
        out = out.reshape(B, D)            # free reshape back; no slicing
    return out


if __name__ == "__main__":
    key = jax.random.PRNGKey(0)
    k_x, k_s, k_b = jax.random.split(key, 3)

    # Small demo shape consistent with the module: batch=8, dim=32 (fold path).
    batch, dim = 8, 32
    scale = jax.random.uniform(k_s, (1, dim), dtype=jnp.float32)
    bias = jax.random.uniform(k_b, (1, dim), dtype=jnp.float32)
    x = jax.random.normal(k_x, (batch, dim), dtype=jnp.float32)

    out = jax.block_until_ready(norm_layer(x, scale, bias))
    ref = jnp.square(scale) * x - bias
    assert out.shape == (batch, dim)
    assert jnp.allclose(out, ref, atol=1e-6, rtol=1e-6)

    # Exercise the other tiling paths:
    #   (256, 384): lane-aligned D, possibly 2 parallel batch steps.
    #   (50, 200):  unaligned large D -> full-extent lane block, ragged batch.
    #   (7, 32):    small D, B not divisible by fold_k -> narrow lane block.
    for (bsz, d2) in [(256, 384), (50, 200), (7, 32)]:
        kx, ks, kb = jax.random.split(jax.random.PRNGKey(bsz + d2), 3)
        s2 = jax.random.uniform(ks, (1, d2), dtype=jnp.float32)
        bi2 = jax.random.uniform(kb, (1, d2), dtype=jnp.float32)
        xx = jax.random.normal(kx, (bsz, d2), dtype=jnp.float32)
        oo = jax.block_until_ready(norm_layer(xx, s2, bi2))
        rr = jnp.square(s2) * xx - bi2
        assert oo.shape == (bsz, d2)
        assert jnp.allclose(oo, rr, atol=1e-6, rtol=1e-6)

    # bf16 activations with f32 params (output stays bf16; math in f32).
    kx, ks, kb = jax.random.split(jax.random.PRNGKey(123), 3)
    s3 = jax.random.uniform(ks, (1, 256), dtype=jnp.float32)
    b3 = jax.random.uniform(kb, (1, 256), dtype=jnp.float32)
    x3 = jax.random.normal(kx, (64, 256), dtype=jnp.bfloat16)
    o3 = jax.block_until_ready(norm_layer(x3, s3, b3))
    r3 = (jnp.square(s3) * x3.astype(jnp.float32) - b3).astype(jnp.bfloat16)
    assert o3.dtype == jnp.bfloat16 and o3.shape == (64, 256)
    assert jnp.allclose(o3.astype(jnp.float32), r3.astype(jnp.float32),
                        atol=2e-2, rtol=2e-2)

    print("KERNEL_OK")
</pallas_src>

<mosaic_0001>
module attributes {stable_mosaic.version = 11 : i64} {
  func.func @_norm_kernel(%arg0: i32, %arg1: i32, %arg2: memref<2x128xf32, #tpu.memory_space<vmem>>, %arg3: memref<1x128xf32, #tpu.memory_space<vmem>>, %arg4: memref<1x128xf32, #tpu.memory_space<vmem>>, %arg5: memref<2x128xf32, #tpu.memory_space<vmem>>) attributes {dimension_semantics = [#tpu.dimension_semantics<parallel>, #tpu.dimension_semantics<parallel>], iteration_bounds = array<i64: 1, 1>, scalar_prefetch = 0 : i64, scratch_operands = 0 : i64, tpu.core_type = #tpu.core_type<tc>, window_params = [{transform_indices = @transform_0, window_bounds = array<i64: 2, 128>}, {transform_indices = @transform_1, window_bounds = array<i64: 1, 128>}, {transform_indices = @transform_2, window_bounds = array<i64: 1, 128>}, {transform_indices = @transform_3, window_bounds = array<i64: 2, 128>}]} {
    %c0 = arith.constant 0 : index
    %c0_0 = arith.constant 0 : index
    %0 = vector.load %arg3[%c0, %c0_0] : memref<1x128xf32, #tpu.memory_space<vmem>>, vector<1x128xf32>
    %c0_1 = arith.constant 0 : index
    %c0_2 = arith.constant 0 : index
    %1 = vector.load %arg4[%c0_1, %c0_2] : memref<1x128xf32, #tpu.memory_space<vmem>>, vector<1x128xf32>
    %c0_3 = arith.constant 0 : index
    %c0_4 = arith.constant 0 : index
    %2 = vector.load %arg2[%c0_3, %c0_4] : memref<2x128xf32, #tpu.memory_space<vmem>>, vector<2x128xf32>
    %3 = arith.mulf %0, %0 : vector<1x128xf32>
    %4 = vector.broadcast %3 : vector<1x128xf32> to vector<2x128xf32>
    %5 = arith.mulf %4, %2 : vector<2x128xf32>
    %6 = vector.broadcast %1 : vector<1x128xf32> to vector<2x128xf32>
    %7 = arith.subf %5, %6 : vector<2x128xf32>
    %c0_5 = arith.constant 0 : index
    %c0_6 = arith.constant 0 : index
    %8 = vector.load %arg5[%c0_5, %c0_6] : memref<2x128xf32, #tpu.memory_space<vmem>>, vector<2x128xf32>
    tpu.vector_store %arg5[%c0_5, %c0_6], %7 {strides = array<i32>} : memref<2x128xf32, #tpu.memory_space<vmem>>, vector<2x128xf32>,
    return
  }
  func.func @transform_0(%arg0: i32, %arg1: i32) -> (i32, i32) {
    %c0_i32 = arith.constant 0 : i32
    return %arg1, %arg0 : i32, i32
  }
  func.func @transform_1(%arg0: i32, %arg1: i32) -> (i32, i32) {
    %c0_i32 = arith.constant 0 : i32
    %c0_i32_0 = arith.constant 0 : i32
    return %c0_i32, %arg0 : i32, i32
  }
  func.func @transform_2(%arg0: i32, %arg1: i32) -> (i32, i32) {
    %c0_i32 = arith.constant 0 : i32
    %c0_i32_0 = arith.constant 0 : i32
    return %c0_i32, %arg0 : i32, i32
  }
  func.func @transform_3(%arg0: i32, %arg1: i32) -> (i32, i32) {
    %c0_i32 = arith.constant 0 : i32
    return %arg1, %arg0 : i32, i32
  }
}

</mosaic_0001>

<bundles_post_ra>
// kernel: tpu_custom_call.1
= control target key start
LH: loop header
LB: loop body
LE: loop exit
PB: predicated region body
PF: predicated region fallthrough
CT: control target
= control target key end

     0   :  { %8 = vsyncpa [#allocation3], 0  ;;  %s191_s0 = inlined_call_operand.hbm [shape: f32[2,128], index: 0, kind: input, shape index: {}]   ;;  %s192_s1 = inlined_call_operand.hbm [shape: f32[1,128], index: 1, kind: input, shape index: {}]   ;;  %s193_s2 = inlined_call_operand.vmem [shape: f32[1,128], index: 2, kind: input, shape index: {}]   ;;  %s194_s3 = inlined_call_operand.hbm [shape: f32[2,128], index: 3, kind: output, shape index: {}]  }
   0x1   :  { %9 = vsyncpa [#allocation6], 0 }
   0x2   :  { %10 = vsyncpa [#allocation4], 0  ;;  %s16_s14 = sshll.u32 %s191_s0, 4  ;;  %s156_s15 = smov [#allocation2]   ;;  %s17_s14 = int_to_ptr.hbm [resolvable:$true] %s16_s14 }
   0x3   :  { %s18_s16 = sshll.u32 %s156_s15, 4  ;;  %s27_s19 = sshll.u32 %s192_s1, 4  ;;  %s19_s16 = int_to_ptr.vmem [resolvable:$true] %s18_s16  ;;  %s28_s19 = int_to_ptr.hbm [resolvable:$true] %s27_s19 }
   0x4   :  { %21 = dma.hbm_to_vmem [thread:$0]  %s17_s14, 32, %s19_s16, [#allocation3]  }
   0x5   :  { %s157_s20 = smov [#allocation5]  }
   0x6   :  { %s29_s21 = sshll.u32 %s157_s20, 4  ;;  %s30_s21 = int_to_ptr.vmem [resolvable:$true] %s29_s21 }
   0x7   :  { %32 = dma.hbm_to_vmem [thread:$0]  %s28_s19, 16, %s30_s21, [#allocation6]  }
   0x8   :  { %150 = dma.done.wait [#allocation3], 32  }
   0x9   :  { %151 = vsyncadd [#allocation3], 4294967264 }
   0xa   :  { %152 = dma.done.wait [#allocation6], 16  }
   0xb   :  { %153 = vsyncadd [#allocation6], 4294967280  ;;  %v43_v0 = vld [vmem:[#allocation5] sm:$0x1]  ;;  %v45_v2 = vld [vmem:[#allocation2] sm:$0x3] }
   0xc   :  { %v46_v1 = vmul.f32 %v43_v0, %v43_v0  ;;  %v77_v4 = vld [vmem:[%s193_s2] ss:$0 sm:$0xff]  ;;  %s158_s23 = smov [#allocation7]   ;;  %s63_s26 = sshll.u32 %s194_s3, 4  ;;  %s64_s26 = int_to_ptr.hbm [resolvable:$true] %s63_s26 }
   0xd   :  { %s61_s1 = sshll.u32 %s158_s23, 4  ;;  %s62_s1 = int_to_ptr.vmem [resolvable:$true] %s61_s1 }
   0xe   :  { %v48_v3 = vperm.slane %v46_v1, 0 }
  0x10   :  { %v50_v5 = vmul.f32 %v48_v3, %v45_v2 }
  0x12   :  { %v54_v6 = vsub.f32 %v50_v5, %v77_v4 }
  0x14   :  { %55 = vst [vmem:[#allocation7] sm:$0x3] %v54_v6 }
  0x15   :  { %66 = dma.vmem_to_hbm [thread:$0]  %s62_s1, 32, %s64_s26, [#allocation4]  }
  0x16   :  { %154 = dma.done.wait [#allocation4], 32  }
  0x17   :  { %155 = vsyncadd [#allocation4], 4294967264 }
  0x18   :  { %71 = vsyncpa [#allocation3], 1 }
  0x19   :  { %72 = vsyncpa [#allocation6], 1 }
  0x1a   :  { %73 = vsyncpa [#allocation4], 1 }

</bundles_post_ra>
